<compile_context>
chip_gen: v6e
topology: v6e:2x2x1
jax: 0.10.0
libtpu: 0.0.40
codegen_flags: <defaults>
</compile_context>

<pallas_src>
import functools
import math

import jax
import jax.numpy as jnp
import numpy as np
from jax.experimental import pallas as pl
from jax.experimental.pallas import tpu as pltpu

PRIMITIVES = ['none', 'max_pool_3x3', 'avg_pool_3x3', 'skip_connect',
              'sep_conv_3x3', 'sep_conv_5x5', 'dil_conv_3x3', 'dil_conv_5x5']

_BN_EPS = 1e-5


def _round_up(x, m):
    return (x + m - 1) // m * m


# ---------------------------------------------------------------------------
# Fused, gridded GEMM:
#   out = [relu?]( [relu?](A) @ B + bias ) [+ add]
# A:(M,K) B:(K,N) bias:(1,N) add:(M,N).  BN(eval) is folded into B/bias by the
# callers; ReLU before the conv via relu_in, BN->ReLU via relu_out; the DARTS
# node branch-sum is fused via `add`.
# A/B are bf16 (MXU native), accumulator and epilogue are f32.
# ---------------------------------------------------------------------------
def _matmul_kernel(*refs, relu_in, relu_out, has_add):
    if has_add:
        a_ref, b_ref, bias_ref, add_ref, o_ref, acc_ref = refs
    else:
        a_ref, b_ref, bias_ref, o_ref, acc_ref = refs
        add_ref = None
    kk = pl.program_id(2)

    @pl.when(kk == 0)
    def _():
        acc_ref[...] = jnp.zeros_like(acc_ref)

    a = a_ref[...]
    if relu_in:
        a = jnp.maximum(a, 0.0)
    acc_ref[...] += jnp.dot(a, b_ref[...], preferred_element_type=jnp.float32)

    @pl.when(kk == pl.num_programs(2) - 1)
    def _():
        y = acc_ref[...] + bias_ref[...]
        if relu_out:
            y = jnp.maximum(y, 0.0)
        if add_ref is not None:
            y = y + add_ref[...]
        o_ref[...] = y


_TM, _TN, _TK = 512, 512, 512   # bf16 A/B + f32 acc ≈ 5 MiB live → fits all gens


def _tile_and_pad(dim, maxt, align):
    d = _round_up(dim, align)
    t = min(d, maxt)
    return t, _round_up(d, t)


def pallas_matmul(a, b, bias, relu_in=False, relu_out=False, add=None):
    m, k = a.shape
    n = b.shape[1]
    tm, mp = _tile_and_pad(m, _TM, 8)      # sublane-aligned M
    tn, np_ = _tile_and_pad(n, _TN, 128)   # lane-dense N (unmasked stores)
    tk, kp = _tile_and_pad(k, _TK, 128)    # lane-dense K

    a = a.astype(jnp.bfloat16)
    b = b.astype(jnp.bfloat16)
    bias = bias.reshape(1, n).astype(jnp.float32)
    if (mp, kp) != (m, k):
        a = jnp.pad(a, ((0, mp - m), (0, kp - k)))
    if (kp, np_) != (k, n):
        b = jnp.pad(b, ((0, kp - k), (0, np_ - n)))
    if np_ != n:
        bias = jnp.pad(bias, ((0, 0), (0, np_ - n)))

    in_specs = [pl.BlockSpec((tm, tk), lambda i, j, kk: (i, kk)),
                pl.BlockSpec((tk, tn), lambda i, j, kk: (kk, j)),
                pl.BlockSpec((1, tn), lambda i, j, kk: (0, j))]
    operands = [a, b, bias]
    has_add = add is not None
    if has_add:
        addp = add.astype(jnp.float32)
        if (mp, np_) != (m, n):
            addp = jnp.pad(addp, ((0, mp - m), (0, np_ - n)))
        in_specs.append(pl.BlockSpec((tm, tn), lambda i, j, kk: (i, j)))
        operands.append(addp)

    out = pl.pallas_call(
        functools.partial(_matmul_kernel, relu_in=relu_in, relu_out=relu_out,
                          has_add=has_add),
        out_shape=jax.ShapeDtypeStruct((mp, np_), jnp.float32),
        grid=(mp // tm, np_ // tn, kp // tk),
        in_specs=in_specs,
        out_specs=pl.BlockSpec((tm, tn), lambda i, j, kk: (i, j)),
        scratch_shapes=[pltpu.VMEM((tm, tn), jnp.float32)],
        compiler_params=pltpu.CompilerParams(
            dimension_semantics=("parallel", "parallel", "arbitrary")),
        cost_estimate=pl.CostEstimate(
            flops=2 * m * n * k, transcendentals=0,
            bytes_accessed=2 * (m * k + k * n) + 4 * m * n),
    )(*operands)
    if (mp, np_) != (m, n):
        out = out[:m, :n]
    return out


# ---------------------------------------------------------------------------
# Lane-dense elementwise add (fallback only — used when neither branch of a
# DARTS node ends in a GEMM whose epilogue could absorb the sum).
# ---------------------------------------------------------------------------
def _add_kernel(a_ref, b_ref, o_ref):
    o_ref[...] = a_ref[...] + b_ref[...]


def pallas_add(a, b):
    shape = a.shape
    total = int(np.prod(shape))
    cols = 128
    rows = -(-total // cols)
    pad_elems = rows * cols - total
    af = a.reshape(-1)
    bf = b.reshape(-1)
    if pad_elems:
        af = jnp.pad(af, (0, pad_elems))
        bf = jnp.pad(bf, (0, pad_elems))
    af = af.reshape(rows, cols)
    bf = bf.reshape(rows, cols)
    tr = min(_round_up(rows, 8), 2048)
    rows_p = _round_up(rows, tr)
    if rows_p != rows:
        af = jnp.pad(af, ((0, rows_p - rows), (0, 0)))
        bf = jnp.pad(bf, ((0, rows_p - rows), (0, 0)))
    out = pl.pallas_call(
        _add_kernel,
        out_shape=jax.ShapeDtypeStruct((rows_p, cols), jnp.float32),
        grid=(rows_p // tr,),
        in_specs=[pl.BlockSpec((tr, cols), lambda i: (i, 0)),
                  pl.BlockSpec((tr, cols), lambda i: (i, 0))],
        out_specs=pl.BlockSpec((tr, cols), lambda i: (i, 0)),
        compiler_params=pltpu.CompilerParams(dimension_semantics=("parallel",)),
    )(af, bf)
    return out.reshape(-1)[:total].reshape(shape)


# ---------------------------------------------------------------------------
# Stencil kernels (depthwise conv, max pool, avg pool).
# One padded spatial tile per batch sample lives in VMEM; k*k taps are
# accumulated from shifted windows in-kernel (no im2col slab in HBM).
# stride-2: the padded input is split into parity slabs (concatenated along H)
# so the kernel computes ONLY the strided output positions from contiguous
# windows — no wasted compute, no post-kernel strided slice.
# ---------------------------------------------------------------------------
def _stencil_prepare(xp, k, stride, dilation, pad_value):
    """Returns (xs, taps, ho, wo).  xs: (N,Hs,Ws,C); taps: [(row_off,col_off)]."""
    n, hp, wp, c = xp.shape
    eff = dilation * (k - 1) + 1
    ho = (hp - eff) // stride + 1
    wo = (wp - eff) // stride + 1
    offs = [i * dilation for i in range(k)]
    if stride == 1:
        taps = [(r, cc) for r in offs for cc in offs]
        return xp, taps, ho, wo
    assert stride == 2
    lh = max(r // 2 for r in offs) + ho
    lw = max(cc // 2 for cc in offs) + wo
    parities = sorted({(r % 2, cc % 2) for r in offs for cc in offs})
    pidx = {p: i for i, p in enumerate(parities)}
    slabs = []
    for (pa, pb) in parities:
        s = xp[:, pa::2, pb::2, :]
        s = jnp.pad(s, ((0, 0), (0, lh - s.shape[1]), (0, lw - s.shape[2]), (0, 0)),
                    constant_values=pad_value)   # uniformity pad — never read
        slabs.append(s)
    xs = jnp.concatenate(slabs, axis=1) if len(slabs) > 1 else slabs[0]
    taps = [(pidx[(r % 2, cc % 2)] * lh + r // 2, cc // 2)
            for r in offs for cc in offs]
    return xs, taps, ho, wo


def _dw_stencil_kernel(x_ref, w_ref, o_ref, *, taps, ho, wo, relu_in):
    tile = x_ref[0]                     # (Hs, Ws, C)
    if relu_in:
        tile = jnp.maximum(tile, 0.0)   # ReLU hoisted out of the tap loop
    acc = None
    for t, (r, c) in enumerate(taps):
        term = tile[r:r + ho, c:c + wo, :] * w_ref[t]
        acc = term if acc is None else acc + term
    o_ref[0] = acc


def depthwise_conv(x, w, k, stride, pad, dilation=1, relu_in=False):
    # w: (k*k, C) — one kxk filter per channel (groups=C)
    n, h, wd, c = x.shape
    xp = jnp.pad(x, ((0, 0), (pad, pad), (pad, pad), (0, 0)))
    xs, taps, ho, wo = _stencil_prepare(xp, k, stride, dilation, 0.0)
    hs, ws = xs.shape[1], xs.shape[2]
    # TODO(synk): with C << 128 the stencil vregs are lane-masked; a channel-
    # group / W-folded lane-dense layout would raise VPU utilization further.
    return pl.pallas_call(
        functools.partial(_dw_stencil_kernel, taps=taps, ho=ho, wo=wo,
                          relu_in=relu_in),
        out_shape=jax.ShapeDtypeStruct((n, ho, wo, c), jnp.float32),
        grid=(n,),
        in_specs=[pl.BlockSpec((1, hs, ws, c), lambda i: (i, 0, 0, 0)),
                  pl.BlockSpec((k * k, 1, 1, c), lambda i: (0, 0, 0, 0))],
        out_specs=pl.BlockSpec((1, ho, wo, c), lambda i: (i, 0, 0, 0)),
        compiler_params=pltpu.CompilerParams(dimension_semantics=("parallel",)),
    )(xs, w.reshape(k * k, 1, 1, c))


def _maxpool_kernel(x_ref, o_ref, *, taps, ho, wo):
    tile = x_ref[0]
    acc = None
    for (r, c) in taps:
        win = tile[r:r + ho, c:c + wo, :]
        acc = win if acc is None else jnp.maximum(acc, win)
    o_ref[0] = acc


def max_pool_3x3(x, stride):
    n, h, w, c = x.shape
    neg = float(np.finfo(np.float32).min)
    xp = jnp.pad(x, ((0, 0), (1, 1), (1, 1), (0, 0)), constant_values=neg)
    xs, taps, ho, wo = _stencil_prepare(xp, 3, stride, 1, neg)
    hs, ws = xs.shape[1], xs.shape[2]
    return pl.pallas_call(
        functools.partial(_maxpool_kernel, taps=taps, ho=ho, wo=wo),
        out_shape=jax.ShapeDtypeStruct((n, ho, wo, c), jnp.float32),
        grid=(n,),
        in_specs=[pl.BlockSpec((1, hs, ws, c), lambda i: (i, 0, 0, 0))],
        out_specs=pl.BlockSpec((1, ho, wo, c), lambda i: (i, 0, 0, 0)),
        compiler_params=pltpu.CompilerParams(dimension_semantics=("parallel",)),
    )(xs)


@functools.lru_cache(maxsize=None)
def _avg_pool_inv_np(h, w, stride):
    # count_include_pad=False divisors for a 3x3/pad=1 window, evaluated
    # directly at the strided output positions (numpy cache, converted per call).
    ones = np.pad(np.ones((h, w), np.float32), 1)
    cnt = np.zeros((h, w), np.float32)
    for ki in range(3):
        for kj in range(3):
            cnt += ones[ki:ki + h, kj:kj + w]
    cnt = cnt[::stride, ::stride]
    return (1.0 / cnt)[None, :, :, None]


def _avgpool_kernel(x_ref, inv_ref, o_ref, *, taps, ho, wo):
    tile = x_ref[0]
    acc = None
    for (r, c) in taps:
        win = tile[r:r + ho, c:c + wo, :]
        acc = win if acc is None else acc + win
    o_ref[0] = acc * inv_ref[0]


def avg_pool_3x3(x, stride):
    n, h, w, c = x.shape
    xp = jnp.pad(x, ((0, 0), (1, 1), (1, 1), (0, 0)))
    xs, taps, ho, wo = _stencil_prepare(xp, 3, stride, 1, 0.0)
    hs, ws = xs.shape[1], xs.shape[2]
    inv = jnp.asarray(_avg_pool_inv_np(h, w, stride))
    return pl.pallas_call(
        functools.partial(_avgpool_kernel, taps=taps, ho=ho, wo=wo),
        out_shape=jax.ShapeDtypeStruct((n, ho, wo, c), jnp.float32),
        grid=(n,),
        in_specs=[pl.BlockSpec((1, hs, ws, c), lambda i: (i, 0, 0, 0)),
                  pl.BlockSpec((1, ho, wo, 1), lambda i: (0, 0, 0, 0))],
        out_specs=pl.BlockSpec((1, ho, wo, c), lambda i: (i, 0, 0, 0)),
        compiler_params=pltpu.CompilerParams(dimension_semantics=("parallel",)),
    )(xs, inv)


# ---------------------------------------------------------------------------
# Global average pooling (AdaptiveAvgPool2d(1)), gridded over the batch.
# ---------------------------------------------------------------------------
def _gap_kernel(x_ref, o_ref):
    o_ref[0] = jnp.mean(x_ref[0], axis=0, keepdims=True)


def global_avg_pool(x):
    n, h, w, c = x.shape
    out = pl.pallas_call(
        _gap_kernel,
        out_shape=jax.ShapeDtypeStruct((n, 1, c), jnp.float32),
        grid=(n,),
        in_specs=[pl.BlockSpec((1, h * w, c), lambda i: (i, 0, 0))],
        out_specs=pl.BlockSpec((1, 1, c), lambda i: (i, 0, 0)),
        compiler_params=pltpu.CompilerParams(dimension_semantics=("parallel",)),
    )(x.reshape(n, h * w, c))
    return out.reshape(n, c)


# ---------------------------------------------------------------------------
# Conv wrappers built on the fused GEMM.
# ---------------------------------------------------------------------------
def fold_bn(w2d, bn, eps=_BN_EPS):
    # eval-mode BN folded into the conv: y = conv(x)*scale + shift
    scale = bn['gamma'] / jnp.sqrt(bn['var'] + eps)
    shift = bn['beta'] - bn['mean'] * scale
    return w2d * scale[None, :], shift


def conv1x1(x, w, bias, stride=1, relu_in=False, relu_out=False, add=None):
    n = x.shape[0]
    # TODO(synk): stride-2 input selection still happens wrapper-side; an
    # element-strided BlockSpec would fold it into the A-block fetch.
    xs = x if stride == 1 else x[:, ::stride, ::stride, :]
    _, ho, wo, cin = xs.shape
    cout = w.shape[1]
    add2 = None if add is None else add.reshape(n * ho * wo, cout)
    out = pallas_matmul(xs.reshape(-1, cin), w, bias,
                        relu_in=relu_in, relu_out=relu_out, add=add2)
    return out.reshape(n, ho, wo, cout)


def extract_patches(x, k, stride, pad):
    n, h, w, c = x.shape
    xp = jnp.pad(x, ((0, 0), (pad, pad), (pad, pad), (0, 0)))
    hp, wp = h + 2 * pad, w + 2 * pad
    ho = (hp - k) // stride + 1
    wo = (wp - k) // stride + 1
    slabs = []
    for ki in range(k):
        for kj in range(k):
            slabs.append(xp[:, ki:ki + (ho - 1) * stride + 1:stride,
                            kj:kj + (wo - 1) * stride + 1:stride, :])
    # stacked directly in GEMM-ready (N,Ho,Wo,tap,C) order — no HBM transpose
    return jnp.stack(slabs, axis=3), ho, wo


def conv_im2col(x, w2d, bias, k, stride, pad, relu_in=False, relu_out=False,
                add=None):
    # Only used for the full (non-depthwise) k>1 conv of the stem.
    n, _, _, cin = x.shape
    patches, ho, wo = extract_patches(x, k, stride, pad)
    pm = patches.reshape(n * ho * wo, k * k * cin)
    cout = w2d.shape[1]
    add2 = None if add is None else add.reshape(n * ho * wo, cout)
    out = pallas_matmul(pm, w2d, bias, relu_in=relu_in, relu_out=relu_out,
                        add=add2)
    return out.reshape(n, ho, wo, cout)


# ---------------------------------------------------------------------------
# Deterministic parameter construction (mirrors the PyTorch module shapes)
# ---------------------------------------------------------------------------
class ParamGen:
    def __init__(self, key):
        self._key = key

    def _next(self):
        self._key, k = jax.random.split(self._key)
        return k

    def normal(self, shape, scale=1.0):
        return jax.random.normal(self._next(), shape, jnp.float32) * scale

    def uniform(self, shape):
        return jax.random.uniform(self._next(), shape, dtype=jnp.float32)

    def conv(self, shape, fan_in):
        return self.normal(shape, math.sqrt(2.0 / fan_in))


def make_bn(pg, c):
    return {'gamma': 1.0 + pg.normal((c,), 0.1),
            'beta': pg.normal((c,), 0.05),
            'mean': pg.normal((c,), 0.05),
            'var': 1.0 + pg.uniform((c,))}


def make_relu_conv_bn(pg, cin, cout, k, stride, pad):
    return {'type': 'rcb', 'k': k, 'stride': stride, 'pad': pad,
            'w': pg.conv((k, k, cin, cout), k * k * cin),
            'bn': make_bn(pg, cout)}


def make_fact_reduce(pg, cin, cout):
    return {'type': 'fr',
            'w1': pg.conv((cin, cout // 2), cin),
            'w2': pg.conv((cin, cout // 2), cin),
            'bn': make_bn(pg, cout)}


def make_sep_conv(pg, c, k, stride, pad):
    return {'type': 'sep', 'k': k, 'stride': stride, 'pad': pad,
            'dw1': pg.conv((k * k, c), k * k), 'pw1': pg.conv((c, c), c),
            'bn1': make_bn(pg, c),
            'dw2': pg.conv((k * k, c), k * k), 'pw2': pg.conv((c, c), c),
            'bn2': make_bn(pg, c)}


def make_dil_conv(pg, c, k, stride, pad, dil):
    return {'type': 'dil', 'k': k, 'stride': stride, 'pad': pad, 'dil': dil,
            'dw': pg.conv((k * k, c), k * k), 'pw': pg.conv((c, c), c),
            'bn': make_bn(pg, c)}


def make_op(pg, name, c, stride):
    if name == 'max_pool_3x3':
        return {'type': 'maxpool', 'stride': stride}
    if name == 'avg_pool_3x3':
        return {'type': 'avgpool', 'stride': stride}
    if name == 'skip_connect':
        return {'type': 'identity'} if stride == 1 else make_fact_reduce(pg, c, c)
    if name == 'sep_conv_3x3':
        return make_sep_conv(pg, c, 3, stride, 1)
    if name == 'sep_conv_5x5':
        return make_sep_conv(pg, c, 5, stride, 2)
    if name == 'dil_conv_3x3':
        return make_dil_conv(pg, c, 3, stride, 2, 2)
    if name == 'dil_conv_5x5':
        return make_dil_conv(pg, c, 5, stride, 4, 2)
    raise ValueError(name)


# ---------------------------------------------------------------------------
# Op application — every conv->BN(->ReLU) chain is a single fused pallas_call;
# the node branch-sum (`add`) is fused into the final GEMM when possible.
# ---------------------------------------------------------------------------
def _ends_in_gemm(p):
    return p['type'] in ('rcb', 'sep', 'dil', 'fr')


def apply_op(p, x, add=None):
    t = p['type']
    if t == 'identity':
        return x
    if t == 'maxpool':
        return max_pool_3x3(x, p['stride'])
    if t == 'avgpool':
        return avg_pool_3x3(x, p['stride'])
    if t == 'rcb':                      # ReLU -> Conv -> BN (one GEMM call)
        cout = p['w'].shape[-1]
        w2d, bias = fold_bn(p['w'].reshape(-1, cout), p['bn'])
        if p['k'] == 1 and p['pad'] == 0:
            return conv1x1(x, w2d, bias, stride=p['stride'], relu_in=True,
                           add=add)
        return conv_im2col(x, w2d, bias, k=p['k'], stride=p['stride'],
                           pad=p['pad'], relu_in=True, add=add)
    if t == 'fr':                       # FactorizedReduce (two fused GEMMs)
        scale = p['bn']['gamma'] / jnp.sqrt(p['bn']['var'] + _BN_EPS)
        shift = p['bn']['beta'] - p['bn']['mean'] * scale
        half = p['w1'].shape[1]
        add_a = None if add is None else add[..., :half]
        add_b = None if add is None else add[..., half:]
        a = conv1x1(x[:, ::2, ::2, :], p['w1'] * scale[:half][None, :],
                    shift[:half], relu_in=True, add=add_a)
        b = conv1x1(x[:, 1::2, 1::2, :], p['w2'] * scale[half:][None, :],
                    shift[half:], relu_in=True, add=add_b)
        return jnp.concatenate([a, b], axis=-1)
    if t == 'sep':                      # SepConv: 2 stencils + 2 fused GEMMs
        k, s, pad = p['k'], p['stride'], p['pad']
        y = depthwise_conv(x, p['dw1'], k, s, pad, relu_in=True)
        w1f, b1f = fold_bn(p['pw1'], p['bn1'])
        y = conv1x1(y, w1f, b1f, relu_out=True)          # 1x1 + BN1 + ReLU
        y = depthwise_conv(y, p['dw2'], k, 1, pad)
        w2f, b2f = fold_bn(p['pw2'], p['bn2'])
        return conv1x1(y, w2f, b2f, add=add)             # 1x1 + BN2 (+ branch add)
    if t == 'dil':                      # DilConv: 1 stencil + 1 fused GEMM
        y = depthwise_conv(x, p['dw'], p['k'], p['stride'], p['pad'],
                           dilation=p['dil'], relu_in=True)
        wf, bf = fold_bn(p['pw'], p['bn'])
        return conv1x1(y, wf, bf, add=add)
    raise ValueError(t)


# ---------------------------------------------------------------------------
# Cell / network construction (mirrors Cell._parse_arch_ / _compile_)
# ---------------------------------------------------------------------------
def parse_arch(weight, steps):
    s_n, e_n = 0, 0
    arch = []
    c_op = len(PRIMITIVES)
    i_op_none = PRIMITIVES.index('none')
    for i_b in range(steps):
        s_n, e_n = e_n, e_n + i_b + 2
        W = weight[s_n:e_n].copy()
        i_ns = sorted(range(i_b + 2),
                      key=lambda i_n: -max(W[i_n][i_op] for i_op in range(c_op)
                                           if i_op != i_op_none))[:2]
        for i_n in i_ns:
            i_op_best = None
            for i_op in range(c_op):
                if i_op == i_op_none:
                    continue
                if i_op_best is None or W[i_n][i_op] > W[i_n][i_op_best]:
                    i_op_best = i_op
            arch.append((PRIMITIVES[i_op_best], i_n))
    return arch


def make_cell(pg, steps, multiplier, c_pp, c_p, c, reduction, reduction_prev,
              weight):
    arch = parse_arch(weight, steps)
    pre0 = (make_fact_reduce(pg, c_pp, c) if reduction_prev
            else make_relu_conv_bn(pg, c_pp, c, 1, 1, 0))
    pre1 = make_relu_conv_bn(pg, c_p, c, 1, 1, 0)
    ops = []
    for name, i_n in arch:
        stride = 2 if (reduction and i_n < 2) else 1
        ops.append(make_op(pg, name, c, stride))
    return {'pre0': pre0, 'pre1': pre1, 'ops': ops, 'arch': arch,
            'steps': steps, 'multiplier': multiplier}


def apply_cell(cell, s0, s1):
    s0 = apply_op(cell['pre0'], s0)
    s1 = apply_op(cell['pre1'], s1)
    stats = [s0, s1]
    for i_b in range(cell['steps']):
        _, i_na = cell['arch'][2 * i_b]
        _, i_nb = cell['arch'][2 * i_b + 1]
        op_a = cell['ops'][2 * i_b]
        op_b = cell['ops'][2 * i_b + 1]
        # TODO(synk): drop_path is skipped — eval-mode forward (training=False).
        if _ends_in_gemm(op_b):
            a = apply_op(op_a, stats[i_na])
            node = apply_op(op_b, stats[i_nb], add=a)       # sum fused in GEMM
        elif _ends_in_gemm(op_a):
            b = apply_op(op_b, stats[i_nb])
            node = apply_op(op_a, stats[i_na], add=b)       # sum fused in GEMM
        else:
            node = pallas_add(apply_op(op_a, stats[i_na]),
                              apply_op(op_b, stats[i_nb]))  # lane-dense fallback
        stats.append(node)
    # TODO(synk): the concat could be folded into the next cell's preprocess
    # GEMM as a K-split accumulation to avoid this HBM materialization.
    return jnp.concatenate(stats[-cell['multiplier']:], axis=-1)


def make_network(pg, C, num_classes, layers, arch_w, steps=4, multiplier=4,
                 stem_multiplier=3):
    c_curr = stem_multiplier * C
    stem = {'w': pg.conv((3, 3, 3, c_curr), 27), 'bn': make_bn(pg, c_curr)}
    c_pp, c_p, c_curr = c_curr, c_curr, C
    cells = []
    reduction_prev = False
    for i in range(layers):
        if i in [layers // 3, 2 * layers // 3]:
            c_curr *= 2
            reduction = True
            weight = arch_w['reduce']
        else:
            reduction = False
            weight = arch_w['normal']
        cell = make_cell(pg, steps, multiplier, c_pp, c_p, c_curr, reduction,
                         reduction_prev, weight)
        reduction_prev = reduction
        cells.append(cell)
        c_pp, c_p = c_p, multiplier * c_curr
    # TODO(synk): AuxiliaryHeadCIFAR only executes when module.training is True;
    # this is an eval-mode forward so logits_aux is None and the aux head is
    # not materialized.
    classifier = {'w': pg.conv((c_p, num_classes), c_p),
                  'b': pg.normal((num_classes,), 0.01)}
    return {'stem': stem, 'cells': cells, 'cls': classifier}


def network_forward(net, x_nchw):
    x = jnp.transpose(x_nchw, (0, 2, 3, 1)).astype(jnp.float32)  # NCHW -> NHWC
    c_stem = net['stem']['w'].shape[-1]
    w2d, bias = fold_bn(net['stem']['w'].reshape(-1, c_stem), net['stem']['bn'])
    x = conv_im2col(x, w2d, bias, k=3, stride=1, pad=1)          # stem: conv3x3+BN fused
    s0 = s1 = x
    for cell in net['cells']:
        s0, s1 = s1, apply_cell(cell, s0, s1)
    pooled = global_avg_pool(s1)                                 # AdaptiveAvgPool2d(1)
    logits = pallas_matmul(pooled, net['cls']['w'], net['cls']['b'])
    return logits, None


if __name__ == "__main__":
    key = jax.random.PRNGKey(0)
    k_params, k_arch_n, k_arch_r, k_data = jax.random.split(key, 4)

    steps = 4
    n_rows = sum(i + 2 for i in range(steps))      # 14 rows, 8 primitives
    arch_w = {
        'normal': np.asarray(jax.random.uniform(k_arch_n, (n_rows, len(PRIMITIVES)),
                                                dtype=jnp.float32)),
        'reduce': np.asarray(jax.random.uniform(k_arch_r, (n_rows, len(PRIMITIVES)),
                                                dtype=jnp.float32)),
    }

    C, num_classes, layers = 4, 10, 3
    pg = ParamGen(k_params)
    net = make_network(pg, C, num_classes, layers, arch_w)

    x = jax.random.normal(k_data, (2, 3, 16, 16), jnp.float32)   # NCHW input
    logits, logits_aux = network_forward(net, x)
    logits = jax.block_until_ready(logits)

    assert logits.shape == (2, num_classes)
    assert logits_aux is None
    assert bool(jnp.all(jnp.isfinite(logits)))
    print("KERNEL_OK")
</pallas_src>

<mosaic_0001>
module attributes {stable_mosaic.version = 11 : i64} {
  func.func @_matmul_kernel(%arg0: i32, %arg1: i32, %arg2: i32, %arg3: memref<512x128xbf16, #tpu.memory_space<vmem>>, %arg4: memref<128x128xbf16, #tpu.memory_space<vmem>>, %arg5: memref<1x128xf32, #tpu.memory_space<vmem>>, %arg6: memref<512x128xf32, #tpu.memory_space<vmem>>, %arg7: memref<512x128xf32, #tpu.memory_space<vmem>>) attributes {dimension_semantics = [#tpu.dimension_semantics<parallel>, #tpu.dimension_semantics<parallel>, #tpu.dimension_semantics<arbitrary>], iteration_bounds = array<i64: 1, 1, 1>, scalar_prefetch = 0 : i64, scratch_operands = 1 : i64, tpu.core_type = #tpu.core_type<tc>, window_params = [{transform_indices = @transform_0, window_bounds = array<i64: 512, 128>}, {transform_indices = @transform_1, window_bounds = array<i64: 128, 128>}, {transform_indices = @transform_2, window_bounds = array<i64: 1, 128>}, {transform_indices = @transform_3, window_bounds = array<i64: 512, 128>}]} {
    %c0_i32 = arith.constant 0 : i32
    %0 = arith.cmpi eq, %arg2, %c0_i32 : i32
    %1 = arith.extui %0 : i1 to i32
    %c0_i32_0 = arith.constant 0 : i32
    %2 = arith.cmpi ne, %1, %c0_i32_0 : i32
    scf.if %2 {
      %cst_10 = arith.constant 0.000000e+00 : f32
      %12 = vector.broadcast %cst_10 : f32 to vector<512x128xf32>
      %c0_11 = arith.constant 0 : index
      %c0_12 = arith.constant 0 : index
      %13 = vector.load %arg7[%c0_11, %c0_12] : memref<512x128xf32, #tpu.memory_space<vmem>>, vector<512x128xf32>
      tpu.vector_store %arg7[%c0_11, %c0_12], %12 {strides = array<i32>} : memref<512x128xf32, #tpu.memory_space<vmem>>, vector<512x128xf32>,
    } else {
    }
    %c0 = arith.constant 0 : index
    %c0_1 = arith.constant 0 : index
    %3 = vector.load %arg3[%c0, %c0_1] : memref<512x128xbf16, #tpu.memory_space<vmem>>, vector<512x128xbf16>
    %c0_2 = arith.constant 0 : index
    %c0_3 = arith.constant 0 : index
    %4 = vector.load %arg7[%c0_2, %c0_3] : memref<512x128xf32, #tpu.memory_space<vmem>>, vector<512x128xf32>
    %c0_4 = arith.constant 0 : index
    %c0_5 = arith.constant 0 : index
    %5 = vector.load %arg4[%c0_4, %c0_5] : memref<128x128xbf16, #tpu.memory_space<vmem>>, vector<128x128xbf16>
    %cst = arith.constant dense<0.000000e+00> : vector<512x128xf32>
    %6 = tpu.matmul %3, %5, %cst {dimension_numbers = #tpu.dot_dimension_numbers<[1], [0], [0], [1], [0, 0, 1, 1], [], []>} : vector<512x128xbf16>, vector<128x128xbf16>, vector<512x128xf32> -> vector<512x128xf32>
    %7 = arith.addf %4, %6 : vector<512x128xf32>
    %c0_6 = arith.constant 0 : index
    %c0_7 = arith.constant 0 : index
    %8 = vector.load %arg7[%c0_6, %c0_7] : memref<512x128xf32, #tpu.memory_space<vmem>>, vector<512x128xf32>
    tpu.vector_store %arg7[%c0_6, %c0_7], %7 {strides = array<i32>} : memref<512x128xf32, #tpu.memory_space<vmem>>, vector<512x128xf32>,
    %c0_i32_8 = arith.constant 0 : i32
    %9 = arith.cmpi eq, %arg2, %c0_i32_8 : i32
    %10 = arith.extui %9 : i1 to i32
    %c0_i32_9 = arith.constant 0 : i32
    %11 = arith.cmpi ne, %10, %c0_i32_9 : i32
    scf.if %11 {
      %c0_10 = arith.constant 0 : index
      %c0_11 = arith.constant 0 : index
      %12 = vector.load %arg7[%c0_10, %c0_11] : memref<512x128xf32, #tpu.memory_space<vmem>>, vector<512x128xf32>
      %c0_12 = arith.constant 0 : index
      %c0_13 = arith.constant 0 : index
      %13 = vector.load %arg5[%c0_12, %c0_13] : memref<1x128xf32, #tpu.memory_space<vmem>>, vector<1x128xf32>
      %14 = vector.broadcast %13 : vector<1x128xf32> to vector<512x128xf32>
      %15 = arith.addf %12, %14 : vector<512x128xf32>
      %c0_14 = arith.constant 0 : index
      %c0_15 = arith.constant 0 : index
      %16 = vector.load %arg6[%c0_14, %c0_15] : memref<512x128xf32, #tpu.memory_space<vmem>>, vector<512x128xf32>
      tpu.vector_store %arg6[%c0_14, %c0_15], %15 {strides = array<i32>} : memref<512x128xf32, #tpu.memory_space<vmem>>, vector<512x128xf32>,
    } else {
    }
    return
  }
  func.func @transform_0(%arg0: i32, %arg1: i32, %arg2: i32) -> (i32, i32) {
    %c0_i32 = arith.constant 0 : i32
    return %arg0, %arg2 : i32, i32
  }
  func.func @transform_1(%arg0: i32, %arg1: i32, %arg2: i32) -> (i32, i32) {
    %c0_i32 = arith.constant 0 : i32
    return %arg2, %arg1 : i32, i32
  }
  func.func @transform_2(%arg0: i32, %arg1: i32, %arg2: i32) -> (i32, i32) {
    %c0_i32 = arith.constant 0 : i32
    %c0_i32_0 = arith.constant 0 : i32
    return %c0_i32, %arg1 : i32, i32
  }
  func.func @transform_3(%arg0: i32, %arg1: i32, %arg2: i32) -> (i32, i32) {
    %c0_i32 = arith.constant 0 : i32
    return %arg0, %arg1 : i32, i32
  }
}

</mosaic_0001>

<bundles_post_ra>
// kernel: tpu_custom_call.1
= control target key start
LH: loop header
LB: loop body
LE: loop exit
PB: predicated region body
PF: predicated region fallthrough
CT: control target
= control target key end

     0   :  { %8 = vsyncpa [#allocation4], 0  ;;  %s1528_s0 = inlined_call_operand.hbm [shape: bf16[512,128], index: 0, kind: input, shape index: {}]   ;;  %s1529_s1 = inlined_call_operand.hbm [shape: bf16[128,128], index: 1, kind: input, shape index: {}]   ;;  %s1530_s2 = inlined_call_operand.vmem [shape: f32[1,128], index: 2, kind: input, shape index: {}]   ;;  %s1531_s3 = inlined_call_operand.hbm [shape: f32[512,128], index: 3, kind: output, shape index: {}]  }
   0x1   :  { %9 = vsyncpa [#allocation7], 0 }
   0x2   :  { %10 = vsyncpa [#allocation5], 0  ;;  %s1423_s12 = smov [#allocation3]  }
   0x3   :  { %s16_s13 = sshll.u32 %s1423_s12, 4  ;;  %s17_s13 = int_to_ptr.vmem [resolvable:$true] %s16_s13 }
   0x4   :  { %s1365_s14 = scalar_lea.vmem %s17_s13, 4096  ;;  %p1370_p1 = scmp.lt.s32.totalorder %s17_s13, %s17_s13 }
   0x5   :  { %p1366_p0 = scmp.ne.s32.totalorder %s17_s13, %s1365_s14  ;;  %p1371_p2 = scmp.lt.s32.totalorder %s1365_s14, %s1365_s14 }
   0x7   :  { %p1372_p3 = por %p1371_p2, %p1370_p1 }
   0x9   :  { %p1373_p4 = pnand %p1372_p3, %p1366_p0 }
   0xb   :  { %1376 = shalt.err (!%p1373_p4)
}
   0xc   :  { %s1424_s15 = smov 64   ;;  %s1425_s16 = smov 4  }
   0xd   :  { %22 = dma.hbm_to_vmem [thread:$0]  %s1528_s0, 4096, %s17_s13, [#allocation4], %s1424_s15, %s1424_s15, %s1425_s16  }
   0xe   :  { %s1426_s19 = smov [#allocation6]  }
   0xf   :  { %s28_s20 = sshll.u32 %s1426_s19, 4  ;;  %s29_s20 = int_to_ptr.vmem [resolvable:$true] %s28_s20 }
  0x10   :  { %s1385_s21 = scalar_lea.vmem %s29_s20, 1024  ;;  %p1390_p6 = scmp.lt.s32.totalorder %s29_s20, %s29_s20 }
  0x11   :  { %p1386_p5 = scmp.ne.s32.totalorder %s29_s20, %s1385_s21  ;;  %p1391_p7 = scmp.lt.s32.totalorder %s1385_s21, %s1385_s21 }
  0x13   :  { %p1392_p8 = por %p1391_p7, %p1390_p6 }
  0x15   :  { %p1393_p9 = pnand %p1392_p8, %p1386_p5 }
  0x17   :  { %1396 = shalt.err (!%p1393_p9)
}
  0x18   :  { %34 = dma.hbm_to_vmem [thread:$0]  %s1529_s1, 1024, %s29_s20, [#allocation7], %s1424_s15, %s1424_s15, %s1425_s16  }
  0x19   :  { %1417 = dma.done.wait [#allocation4], 4096  }
  0x1a   :  { %1418 = vsyncadd [#allocation4], 4294963200 }
  0x1b   :  { %1419 = dma.done.wait [#allocation7], 1024  }
  0x1c   :  { %1420 = vsyncadd [#allocation7], 4294966272  ;;  %v1317_v0 = vld [vmem:[#allocation6 + $0x38] sm:$0xff]   ;;  %v1318_v1 = vld [vmem:[#allocation6 + $0x30] sm:$0xff]  }
  0x1d   :  { %1214 = vmatprep.subr.bf16.mxu0 %v1317_v0  ;;  %1294 = vmatprep.subr.bf16.mxu1 %v1317_v0  ;;  %v1319_v2 = vld [vmem:[#allocation6 + $0x28] sm:$0xff]   ;;  %v1320_v3 = vld [vmem:[#allocation6 + $0x20] sm:$0xff]   ;;  %v1321_v6 = vld [vmem:[#allocation6 + $0x18] sm:$0xff]  }
  0x1e   :  { %1215 = vmatpush3.bf16.msra.mxu0 %v1317_v0  ;;  %1302 = vmatpush3.bf16.msra.mxu1 %v1317_v0  ;;  %v1325_v4 = vld [vmem:[#allocation3] sm:$0xff]   ;;  %v1322_v7 = vld [vmem:[#allocation6 + $0x10] sm:$0xff]   ;;  %v1323_v8 = vld [vmem:[#allocation6 + $0x8] sm:$0xff]  }
  0x1f   :  { %1216 = vmatprep.subr.bf16.mxu0 %v1318_v1  ;;  %1295 = vmatprep.subr.bf16.mxu1 %v1318_v1  ;;  %v1326_v5 = vld [vmem:[#allocation3 + $0x80] sm:$0xff]   ;;  %v1327_v10 = vld [vmem:[#allocation3 + $0x8] sm:$0xff]   ;;  %v1329_v12 = vld [vmem:[#allocation3 + $0x10] sm:$0xff]  }
  0x20   :  { %1230 = vmatprep.mubr.bf16.mxu0 %v1325_v4  ;;  %1262 = vmatprep.mubr.bf16.mxu1 %v1326_v5  ;;  %v1324_v9 = vld [vmem:[#allocation6] sm:$0xff]   ;;  %v1328_v11 = vld [vmem:[#allocation3 + $0x88] sm:$0xff]   ;;  %v1330_v13 = vld [vmem:[#allocation3 + $0x90] sm:$0xff]  }
  0x21   :  { %v1331_v14 = vld [vmem:[#allocation3 + $0x18] sm:$0xff]   ;;  %v1333_v16 = vld [vmem:[#allocation3 + $0x20] sm:$0xff]   ;;  %v1335_v18 = vld [vmem:[#allocation3 + $0x28] sm:$0xff]  }
  0x22   :  { %1217 = vmatpush3.bf16.msra.mxu0 %v1318_v1  ;;  %1303 = vmatpush3.bf16.msra.mxu1 %v1318_v1  ;;  %v1332_v15 = vld [vmem:[#allocation3 + $0x98] sm:$0xff]   ;;  %v1334_v17 = vld [vmem:[#allocation3 + $0xa0] sm:$0xff]   ;;  %v1336_v19 = vld [vmem:[#allocation3 + $0xa8] sm:$0xff]  }
  0x23   :  { %1218 = vmatprep.subr.bf16.mxu0 %v1319_v2  ;;  %1296 = vmatprep.subr.bf16.mxu1 %v1319_v2  ;;  %v1337_v20 = vld [vmem:[#allocation3 + $0x30] sm:$0xff]   ;;  %v1339_v22 = vld [vmem:[#allocation3 + $0x38] sm:$0xff]   ;;  %v1341_v24 = vld [vmem:[#allocation3 + $0x40] sm:$0xff]  }
  0x24   :  { %v1338_v21 = vld [vmem:[#allocation3 + $0xb0] sm:$0xff]   ;;  %v1340_v23 = vld [vmem:[#allocation3 + $0xb8] sm:$0xff]   ;;  %v1342_v25 = vld [vmem:[#allocation3 + $0xc0] sm:$0xff]  }
  0x25   :  { %v1343_v26 = vld [vmem:[#allocation3 + $0x48] sm:$0xff]   ;;  %v1345_v28 = vld [vmem:[#allocation3 + $0x50] sm:$0xff]   ;;  %v1347_v30 = vld [vmem:[#allocation3 + $0x58] sm:$0xff]  }
  0x26   :  { %1219 = vmatpush3.bf16.msra.mxu0 %v1319_v2  ;;  %1304 = vmatpush3.bf16.msra.mxu1 %v1319_v2  ;;  %v1344_v27 = vld [vmem:[#allocation3 + $0xc8] sm:$0xff]   ;;  %v1346_v29 = vld [vmem:[#allocation3 + $0xd0] sm:$0xff]   ;;  %v1348_v31 = vld [vmem:[#allocation3 + $0xd8] sm:$0xff]  }
  0x27   :  { %1220 = vmatprep.subr.bf16.mxu0 %v1320_v3  ;;  %1297 = vmatprep.subr.bf16.mxu1 %v1320_v3  ;;  %v1349_v32 = vld [vmem:[#allocation3 + $0x60] sm:$0xff]   ;;  %v1351_v34 = vld [vmem:[#allocation3 + $0x68] sm:$0xff]   ;;  %v1353_v36 = vld [vmem:[#allocation3 + $0x70] sm:$0xff]  }
  0x28   :  { %v1350_v33 = vld [vmem:[#allocation3 + $0xe0] sm:$0xff]   ;;  %v1352_v35 = vld [vmem:[#allocation3 + $0xe8] sm:$0xff]   ;;  %v1354_v37 = vld [vmem:[#allocation3 + $0xf0] sm:$0xff]  }
  0x29   :  { %v1355_v38 = vld [vmem:[#allocation3 + $0x78] sm:$0xff]   ;;  %v1459_v40 = vld [vmem:[%s1530_s2] ss:$0 sm:$0xff]  ;;  %s1427_s2 = smov [#allocation8]  }
  0x2a   :  { %1221 = vmatpush3.bf16.msra.mxu0 %v1320_v3  ;;  %1305 = vmatpush3.bf16.msra.mxu1 %v1320_v3  ;;  %v1356_v39 = vld [vmem:[#allocation3 + $0xf8] sm:$0xff]   ;;  %s1120_s24 = sshll.u32 %s1427_s2, 4  ;;  %s1121_s24 = int_to_ptr.vmem [resolvable:$true] %s1120_s24 }
  0x2b   :  { %1222 = vmatprep.subr.bf16.mxu0 %v1321_v6  ;;  %1298 = vmatprep.subr.bf16.mxu1 %v1321_v6  ;;  %s1397_s25 = scalar_lea.vmem %s1121_s24, 8192  ;;  %p1402_p11 = scmp.lt.s32.totalorder %s1121_s24, %s1121_s24 }
  0x2c   :  { %p1398_p10 = scmp.ne.s32.totalorder %s1121_s24, %s1397_s25  ;;  %p1403_p12 = scmp.lt.s32.totalorder %s1397_s25, %s1397_s25 }
  0x2e   :  { %1223 = vmatpush3.bf16.msra.mxu0 %v1321_v6  ;;  %1306 = vmatpush3.bf16.msra.mxu1 %v1321_v6  ;;  %p1404_p13 = por %p1403_p12, %p1402_p11 }
  0x2f   :  { %1224 = vmatprep.subr.bf16.mxu0 %v1322_v7  ;;  %1299 = vmatprep.subr.bf16.mxu1 %v1322_v7 }
  0x30   :  { %p1405_p0 = pnand %p1404_p13, %p1398_p10 }
  0x32   :  { %1225 = vmatpush3.bf16.msra.mxu0 %v1322_v7  ;;  %1307 = vmatpush3.bf16.msra.mxu1 %v1322_v7 }
  0x33   :  { %1226 = vmatprep.subr.bf16.mxu0 %v1323_v8  ;;  %1300 = vmatprep.subr.bf16.mxu1 %v1323_v8 }
  0x36   :  { %1227 = vmatpush3.bf16.msra.mxu0 %v1323_v8  ;;  %1308 = vmatpush3.bf16.msra.mxu1 %v1323_v8 }
  0x37   :  { %1228 = vmatprep.subr.bf16.mxu0 %v1324_v9  ;;  %1301 = vmatprep.subr.bf16.mxu1 %v1324_v9 }
  0x3a   :  { %1229 = vmatpush3.bf16.msra.mxu0 %v1324_v9  ;;  %1309 = vmatpush3.bf16.msra.mxu1 %v1324_v9 }
  0x3d   :  { %1231 = vmatmul.mubr.bf16.vlgmr.msra.gmra.mxu0 %v1327_v10  ;;  %1263 = vmatmul.mubr.bf16.vlgmr.msra.gmra.mxu1 %v1328_v11 }
  0x3e   :  { %1234 = vmatprep.mubr.bf16.mxu0 %v1329_v12  ;;  %1266 = vmatprep.mubr.bf16.mxu1 %v1330_v13 }
  0x45   :  { %1235 = vmatmul.mubr.bf16.gmra.mxu0 %v1331_v14  ;;  %1267 = vmatmul.mubr.bf16.gmra.mxu1 %v1332_v15 }
  0x46   :  { %1238 = vmatprep.mubr.bf16.mxu0 %v1333_v16  ;;  %1270 = vmatprep.mubr.bf16.mxu1 %v1334_v17 }
  0x4d   :  { %1239 = vmatmul.mubr.bf16.gmra.mxu0 %v1335_v18  ;;  %1271 = vmatmul.mubr.bf16.gmra.mxu1 %v1336_v19 }
  0x4e   :  { %1242 = vmatprep.mubr.bf16.mxu0 %v1337_v20  ;;  %1274 = vmatprep.mubr.bf16.mxu1 %v1338_v21 }
  0x55   :  { %1243 = vmatmul.mubr.bf16.gmra.mxu0 %v1339_v22  ;;  %1275 = vmatmul.mubr.bf16.gmra.mxu1 %v1340_v23 }
  0x56   :  { %1246 = vmatprep.mubr.bf16.mxu0 %v1341_v24  ;;  %1278 = vmatprep.mubr.bf16.mxu1 %v1342_v25 }
  0x5d   :  { %1247 = vmatmul.mubr.bf16.gmra.mxu0 %v1343_v26  ;;  %1279 = vmatmul.mubr.bf16.gmra.mxu1 %v1344_v27 }
  0x5e   :  { %1250 = vmatprep.mubr.bf16.mxu0 %v1345_v28  ;;  %1282 = vmatprep.mubr.bf16.mxu1 %v1346_v29 }
  0x65   :  { %1251 = vmatmul.mubr.bf16.gmra.mxu0 %v1347_v30  ;;  %1283 = vmatmul.mubr.bf16.gmra.mxu1 %v1348_v31 }
  0x66   :  { %1254 = vmatprep.mubr.bf16.mxu0 %v1349_v32  ;;  %1286 = vmatprep.mubr.bf16.mxu1 %v1350_v33 }
  0x6d   :  { %1255 = vmatmul.mubr.bf16.gmra.mxu0 %v1351_v34  ;;  %1287 = vmatmul.mubr.bf16.gmra.mxu1 %v1352_v35 }
  0x6e   :  { %1258 = vmatprep.mubr.bf16.mxu0 %v1353_v36  ;;  %1290 = vmatprep.mubr.bf16.mxu1 %v1354_v37 }
  0x75   :  { %1259 = vmatmul.mubr.bf16.gmra.mxu0 %v1355_v38  ;;  %1291 = vmatmul.mubr.bf16.gmra.mxu1 %v1356_v39 }
  0xfd   :  { %v1232_v41 = vpop.f32.mrf.mxu0  ;;  %v1264_v42 = vpop.f32.mrf.mxu1 }
  0xfe   :  { %v989_v43 = vadd.f32 %v1232_v41, %v1459_v40  ;;  %v1021_v44 = vadd.f32 %v1264_v42, %v1459_v40 }
  0xff   :  { %v530_v45 = vpop.f32.mrf.mxu0  ;;  %v658_v46 = vpop.f32.mrf.mxu1 }
 0x100   :  { %1053 = vst [vmem:[#allocation8 + $0x10] sm:$0xff] %v989_v43  ;;  %1085 = vst [vmem:[#allocation8 + $0x110] sm:$0xff] %v1021_v44  ;;  %v987_v47 = vadd.f32 %v1459_v40, %v530_v45  ;;  %v1019_v48 = vadd.f32 %v1459_v40, %v658_v46 }
 0x101   :  { %v1233_v49 = vpop.f32.mrf.mxu0  ;;  %v1265_v50 = vpop.f32.mrf.mxu1 }
 0x102   :  { %1051 = vst [vmem:[#allocation8] sm:$0xff] %v987_v47  ;;  %1083 = vst [vmem:[#allocation8 + $0x100] sm:$0xff] %v1019_v48  ;;  %v990_v51 = vadd.f32 %v1233_v49, %v1459_v40  ;;  %v1022_v52 = vadd.f32 %v1265_v50, %v1459_v40 }
 0x103   :  { %v533_v53 = vpop.f32.mrf.mxu0  ;;  %v661_v54 = vpop.f32.mrf.mxu1 }
 0x104   :  { %1054 = vst [vmem:[#allocation8 + $0x18] sm:$0xff] %v990_v51  ;;  %1086 = vst [vmem:[#allocation8 + $0x118] sm:$0xff] %v1022_v52  ;;  %v988_v55 = vadd.f32 %v1459_v40, %v533_v53  ;;  %v1020_v56 = vadd.f32 %v1459_v40, %v661_v54 }
 0x105   :  { %v1236_v57 = vpop.f32.mrf.mxu0  ;;  %v1268_v58 = vpop.f32.mrf.mxu1 }
 0x106   :  { %1052 = vst [vmem:[#allocation8 + $0x8] sm:$0xff] %v988_v55  ;;  %1084 = vst [vmem:[#allocation8 + $0x108] sm:$0xff] %v1020_v56  ;;  %v993_v59 = vadd.f32 %v1236_v57, %v1459_v40  ;;  %v1025_v60 = vadd.f32 %v1268_v58, %v1459_v40 }
 0x107   :  { %v546_v61 = vpop.f32.mrf.mxu0  ;;  %v674_v62 = vpop.f32.mrf.mxu1 }
 0x108   :  { %1057 = vst [vmem:[#allocation8 + $0x30] sm:$0xff] %v993_v59  ;;  %1089 = vst [vmem:[#allocation8 + $0x130] sm:$0xff] %v1025_v60  ;;  %v991_v63 = vadd.f32 %v1459_v40, %v546_v61  ;;  %v1023_v0 = vadd.f32 %v1459_v40, %v674_v62 }
 0x109   :  { %v1237_v1 = vpop.f32.mrf.mxu0  ;;  %v1269_v2 = vpop.f32.mrf.mxu1 }
 0x10a   :  { %1055 = vst [vmem:[#allocation8 + $0x20] sm:$0xff] %v991_v63  ;;  %1087 = vst [vmem:[#allocation8 + $0x120] sm:$0xff] %v1023_v0  ;;  %v994_v3 = vadd.f32 %v1237_v1, %v1459_v40  ;;  %v1026_v4 = vadd.f32 %v1269_v2, %v1459_v40 }
 0x10b   :  { %v549_v5 = vpop.f32.mrf.mxu0  ;;  %v677_v6 = vpop.f32.mrf.mxu1 }
 0x10c   :  { %1058 = vst [vmem:[#allocation8 + $0x38] sm:$0xff] %v994_v3  ;;  %1090 = vst [vmem:[#allocation8 + $0x138] sm:$0xff] %v1026_v4  ;;  %v992_v7 = vadd.f32 %v1459_v40, %v549_v5  ;;  %v1024_v8 = vadd.f32 %v1459_v40, %v677_v6 }
 0x10d   :  { %v1240_v9 = vpop.f32.mrf.mxu0  ;;  %v1272_v10 = vpop.f32.mrf.mxu1 }
 0x10e   :  { %1056 = vst [vmem:[#allocation8 + $0x28] sm:$0xff] %v992_v7  ;;  %1088 = vst [vmem:[#allocation8 + $0x128] sm:$0xff] %v1024_v8  ;;  %v997_v11 = vadd.f32 %v1240_v9, %v1459_v40  ;;  %v1029_v12 = vadd.f32 %v1272_v10, %v1459_v40 }
 0x10f   :  { %v562_v13 = vpop.f32.mrf.mxu0  ;;  %v690_v14 = vpop.f32.mrf.mxu1 }
 0x110   :  { %1061 = vst [vmem:[#allocation8 + $0x50] sm:$0xff] %v997_v11  ;;  %1093 = vst [vmem:[#allocation8 + $0x150] sm:$0xff] %v1029_v12  ;;  %v995_v15 = vadd.f32 %v1459_v40, %v562_v13  ;;  %v1027_v16 = vadd.f32 %v1459_v40, %v690_v14 }
 0x111   :  { %v1241_v17 = vpop.f32.mrf.mxu0  ;;  %v1273_v18 = vpop.f32.mrf.mxu1 }
 0x112   :  { %1059 = vst [vmem:[#allocation8 + $0x40] sm:$0xff] %v995_v15  ;;  %1091 = vst [vmem:[#allocation8 + $0x140] sm:$0xff] %v1027_v16  ;;  %v998_v19 = vadd.f32 %v1241_v17, %v1459_v40  ;;  %v1030_v20 = vadd.f32 %v1273_v18, %v1459_v40 }
 0x113   :  { %v565_v21 = vpop.f32.mrf.mxu0  ;;  %v693_v22 = vpop.f32.mrf.mxu1 }
 0x114   :  { %1062 = vst [vmem:[#allocation8 + $0x58] sm:$0xff] %v998_v19  ;;  %1094 = vst [vmem:[#allocation8 + $0x158] sm:$0xff] %v1030_v20  ;;  %v996_v23 = vadd.f32 %v1459_v40, %v565_v21  ;;  %v1028_v24 = vadd.f32 %v1459_v40, %v693_v22 }
 0x115   :  { %v1244_v25 = vpop.f32.mrf.mxu0  ;;  %v1276_v26 = vpop.f32.mrf.mxu1 }
 0x116   :  { %1060 = vst [vmem:[#allocation8 + $0x48] sm:$0xff] %v996_v23  ;;  %1092 = vst [vmem:[#allocation8 + $0x148] sm:$0xff] %v1028_v24  ;;  %v1001_v27 = vadd.f32 %v1244_v25, %v1459_v40  ;;  %v1033_v28 = vadd.f32 %v1276_v26, %v1459_v40 }
 0x117   :  { %v578_v29 = vpop.f32.mrf.mxu0  ;;  %v706_v30 = vpop.f32.mrf.mxu1 }
 0x118   :  { %1065 = vst [vmem:[#allocation8 + $0x70] sm:$0xff] %v1001_v27  ;;  %1097 = vst [vmem:[#allocation8 + $0x170] sm:$0xff] %v1033_v28  ;;  %v999_v31 = vadd.f32 %v1459_v40, %v578_v29  ;;  %v1031_v32 = vadd.f32 %v1459_v40, %v706_v30 }
 0x119   :  { %v1245_v33 = vpop.f32.mrf.mxu0  ;;  %v1277_v34 = vpop.f32.mrf.mxu1 }
 0x11a   :  { %1063 = vst [vmem:[#allocation8 + $0x60] sm:$0xff] %v999_v31  ;;  %1095 = vst [vmem:[#allocation8 + $0x160] sm:$0xff] %v1031_v32  ;;  %v1002_v35 = vadd.f32 %v1245_v33, %v1459_v40  ;;  %v1034_v36 = vadd.f32 %v1277_v34, %v1459_v40 }
 0x11b   :  { %v581_v37 = vpop.f32.mrf.mxu0  ;;  %v709_v38 = vpop.f32.mrf.mxu1 }
 0x11c   :  { %1066 = vst [vmem:[#allocation8 + $0x78] sm:$0xff] %v1002_v35  ;;  %1098 = vst [vmem:[#allocation8 + $0x178] sm:$0xff] %v1034_v36  ;;  %v1000_v39 = vadd.f32 %v1459_v40, %v581_v37  ;;  %v1032_v41 = vadd.f32 %v1459_v40, %v709_v38 }
 0x11d   :  { %v1248_v42 = vpop.f32.mrf.mxu0  ;;  %v1280_v43 = vpop.f32.mrf.mxu1 }
 0x11e   :  { %1064 = vst [vmem:[#allocation8 + $0x68] sm:$0xff] %v1000_v39  ;;  %1096 = vst [vmem:[#allocation8 + $0x168] sm:$0xff] %v1032_v41  ;;  %v1005_v44 = vadd.f32 %v1248_v42, %v1459_v40  ;;  %v1037_v45 = vadd.f32 %v1280_v43, %v1459_v40 }
 0x11f   :  { %v594_v46 = vpop.f32.mrf.mxu0  ;;  %v722_v47 = vpop.f32.mrf.mxu1 }
 0x120   :  { %1069 = vst [vmem:[#allocation8 + $0x90] sm:$0xff] %v1005_v44  ;;  %1101 = vst [vmem:[#allocation8 + $0x190] sm:$0xff] %v1037_v45  ;;  %v1003_v48 = vadd.f32 %v1459_v40, %v594_v46  ;;  %v1035_v49 = vadd.f32 %v1459_v40, %v722_v47 }
 0x121   :  { %v1249_v50 = vpop.f32.mrf.mxu0  ;;  %v1281_v51 = vpop.f32.mrf.mxu1 }
 0x122   :  { %1067 = vst [vmem:[#allocation8 + $0x80] sm:$0xff] %v1003_v48  ;;  %1099 = vst [vmem:[#allocation8 + $0x180] sm:$0xff] %v1035_v49  ;;  %v1006_v52 = vadd.f32 %v1249_v50, %v1459_v40  ;;  %v1038_v53 = vadd.f32 %v1281_v51, %v1459_v40 }
 0x123   :  { %v597_v54 = vpop.f32.mrf.mxu0  ;;  %v725_v55 = vpop.f32.mrf.mxu1 }
 0x124   :  { %1070 = vst [vmem:[#allocation8 + $0x98] sm:$0xff] %v1006_v52  ;;  %1102 = vst [vmem:[#allocation8 + $0x198] sm:$0xff] %v1038_v53  ;;  %v1004_v56 = vadd.f32 %v1459_v40, %v597_v54  ;;  %v1036_v57 = vadd.f32 %v1459_v40, %v725_v55 }
 0x125   :  { %v1252_v58 = vpop.f32.mrf.mxu0  ;;  %v1284_v59 = vpop.f32.mrf.mxu1 }
 0x126   :  { %1068 = vst [vmem:[#allocation8 + $0x88] sm:$0xff] %v1004_v56  ;;  %1100 = vst [vmem:[#allocation8 + $0x188] sm:$0xff] %v1036_v57  ;;  %v1009_v60 = vadd.f32 %v1252_v58, %v1459_v40  ;;  %v1041_v61 = vadd.f32 %v1284_v59, %v1459_v40 }
 0x127   :  { %v610_v62 = vpop.f32.mrf.mxu0  ;;  %v738_v63 = vpop.f32.mrf.mxu1 }
 0x128   :  { %1073 = vst [vmem:[#allocation8 + $0xb0] sm:$0xff] %v1009_v60  ;;  %1105 = vst [vmem:[#allocation8 + $0x1b0] sm:$0xff] %v1041_v61  ;;  %v1007_v0 = vadd.f32 %v1459_v40, %v610_v62  ;;  %v1039_v1 = vadd.f32 %v1459_v40, %v738_v63 }
 0x129   :  { %v1253_v2 = vpop.f32.mrf.mxu0  ;;  %v1285_v3 = vpop.f32.mrf.mxu1 }
 0x12a   :  { %1071 = vst [vmem:[#allocation8 + $0xa0] sm:$0xff] %v1007_v0  ;;  %1103 = vst [vmem:[#allocation8 + $0x1a0] sm:$0xff] %v1039_v1  ;;  %v1010_v4 = vadd.f32 %v1253_v2, %v1459_v40  ;;  %v1042_v5 = vadd.f32 %v1285_v3, %v1459_v40 }
 0x12b   :  { %v613_v6 = vpop.f32.mrf.mxu0  ;;  %v741_v7 = vpop.f32.mrf.mxu1 }
 0x12c   :  { %1074 = vst [vmem:[#allocation8 + $0xb8] sm:$0xff] %v1010_v4  ;;  %1106 = vst [vmem:[#allocation8 + $0x1b8] sm:$0xff] %v1042_v5  ;;  %v1008_v8 = vadd.f32 %v1459_v40, %v613_v6  ;;  %v1040_v9 = vadd.f32 %v1459_v40, %v741_v7 }
 0x12d   :  { %v1256_v10 = vpop.f32.mrf.mxu0  ;;  %v1288_v11 = vpop.f32.mrf.mxu1 }
 0x12e   :  { %1072 = vst [vmem:[#allocation8 + $0xa8] sm:$0xff] %v1008_v8  ;;  %1104 = vst [vmem:[#allocation8 + $0x1a8] sm:$0xff] %v1040_v9  ;;  %v1013_v12 = vadd.f32 %v1256_v10, %v1459_v40  ;;  %v1045_v13 = vadd.f32 %v1288_v11, %v1459_v40 }
 0x12f   :  { %v626_v14 = vpop.f32.mrf.mxu0  ;;  %v754_v15 = vpop.f32.mrf.mxu1 }
 0x130   :  { %1077 = vst [vmem:[#allocation8 + $0xd0] sm:$0xff] %v1013_v12  ;;  %1109 = vst [vmem:[#allocation8 + $0x1d0] sm:$0xff] %v1045_v13  ;;  %v1011_v16 = vadd.f32 %v1459_v40, %v626_v14  ;;  %v1043_v17 = vadd.f32 %v1459_v40, %v754_v15 }
 0x131   :  { %v1257_v18 = vpop.f32.mrf.mxu0  ;;  %v1289_v19 = vpop.f32.mrf.mxu1 }
 0x132   :  { %1075 = vst [vmem:[#allocation8 + $0xc0] sm:$0xff] %v1011_v16  ;;  %1107 = vst [vmem:[#allocation8 + $0x1c0] sm:$0xff] %v1043_v17  ;;  %v1014_v20 = vadd.f32 %v1257_v18, %v1459_v40  ;;  %v1046_v21 = vadd.f32 %v1289_v19, %v1459_v40 }
 0x133   :  { %v629_v22 = vpop.f32.mrf.mxu0  ;;  %v757_v23 = vpop.f32.mrf.mxu1 }
 0x134   :  { %1078 = vst [vmem:[#allocation8 + $0xd8] sm:$0xff] %v1014_v20  ;;  %1110 = vst [vmem:[#allocation8 + $0x1d8] sm:$0xff] %v1046_v21  ;;  %v1012_v24 = vadd.f32 %v1459_v40, %v629_v22  ;;  %v1044_v25 = vadd.f32 %v1459_v40, %v757_v23 }
 0x135   :  { %v1260_v26 = vpop.f32.mrf.mxu0  ;;  %v1292_v27 = vpop.f32.mrf.mxu1 }
 0x136   :  { %1076 = vst [vmem:[#allocation8 + $0xc8] sm:$0xff] %v1012_v24  ;;  %1108 = vst [vmem:[#allocation8 + $0x1c8] sm:$0xff] %v1044_v25  ;;  %v1017_v28 = vadd.f32 %v1260_v26, %v1459_v40  ;;  %v1049_v29 = vadd.f32 %v1292_v27, %v1459_v40 }
 0x137   :  { %v642_v30 = vpop.f32.mrf.mxu0  ;;  %v770_v31 = vpop.f32.mrf.mxu1 }
 0x138   :  { %1081 = vst [vmem:[#allocation8 + $0xf0] sm:$0xff] %v1017_v28  ;;  %1113 = vst [vmem:[#allocation8 + $0x1f0] sm:$0xff] %v1049_v29  ;;  %v1015_v32 = vadd.f32 %v1459_v40, %v642_v30  ;;  %v1047_v33 = vadd.f32 %v1459_v40, %v770_v31 }
 0x139   :  { %v1261_v34 = vpop.f32.mrf.mxu0  ;;  %v1293_v35 = vpop.f32.mrf.mxu1 }
 0x13a   :  { %1079 = vst [vmem:[#allocation8 + $0xe0] sm:$0xff] %v1015_v32  ;;  %1111 = vst [vmem:[#allocation8 + $0x1e0] sm:$0xff] %v1047_v33  ;;  %v1018_v36 = vadd.f32 %v1261_v34, %v1459_v40  ;;  %v1050_v37 = vadd.f32 %v1293_v35, %v1459_v40 }
 0x13b   :  { %v645_v38 = vpop.f32.mrf.mxu0  ;;  %v773_v39 = vpop.f32.mrf.mxu1 }
 0x13c   :  { %1082 = vst [vmem:[#allocation8 + $0xf8] sm:$0xff] %v1018_v36  ;;  %1114 = vst [vmem:[#allocation8 + $0x1f8] sm:$0xff] %v1050_v37  ;;  %v1016_v41 = vadd.f32 %v1459_v40, %v645_v38  ;;  %v1048_v42 = vadd.f32 %v1459_v40, %v773_v39 }
 0x13e   :  { %1080 = vst [vmem:[#allocation8 + $0xe8] sm:$0xff] %v1016_v41  ;;  %1112 = vst [vmem:[#allocation8 + $0x1e8] sm:$0xff] %v1048_v42 }
 0x13f   :  { %1408 = shalt.err (!%p1405_p0)
}
 0x140   :  { %s1428_s26 = smov 128   ;;  %s1429_s27 = smov 8  }
 0x141   :  { %1126 = dma.vmem_to_hbm [thread:$0]  %s1121_s24, 8192, %s1531_s3, [#allocation5], %s1428_s26, %s1428_s26, %s1429_s27  }
 0x142   :  { %1421 = dma.done.wait [#allocation5], 8192  }
 0x143   :  { %1422 = vsyncadd [#allocation5], 4294959104 }
 0x144   :  { %1130 = vsyncpa [#allocation4], 1 }
 0x145   :  { %1131 = vsyncpa [#allocation7], 1 }
 0x146   :  { %1132 = vsyncpa [#allocation5], 1 }

</bundles_post_ra>
